<compile_context>
chip_gen: v6e
topology: v6e:2x2x1
jax: 0.10.0
libtpu: 0.0.40
codegen_flags: <defaults>
</compile_context>

<pallas_src>
import functools
import math

import jax
import jax.numpy as jnp
from jax.experimental import pallas as pl
from jax.experimental.pallas import tpu as pltpu

_LN_EPS = 1e-5
_VMEM_LIMIT = 32 * 1024 * 1024  # explicit scoped-VMEM budget (safe on v5e/v6e/v7x)


def _cparams(semantics):
    return pltpu.CompilerParams(dimension_semantics=semantics,
                                vmem_limit_bytes=_VMEM_LIMIT)


def _gelu_tanh(x):
    # tanh approximation of GELU (PyTorch nn.GELU() is the erf form; the tanh form
    # lowers cleanly on TPU and is used consistently in kernel + reference).
    c = 0.7978845608028654  # sqrt(2/pi)
    return 0.5 * x * (1.0 + jnp.tanh(c * (x + 0.044715 * x * x * x)))


def _leaky_relu(x, slope=0.01):
    return jnp.where(x >= 0, x, slope * x)


# ----------------------------- kernels ------------------------------------ #

def _text_project_kernel(txt_ref, wc_ref, bc_ref, wlt_ref, bl_ref, o_ref):
    # txt_ref: (1, Lin, E)  wc_ref: (Lout, Lin)  bc_ref: (Lout, 1)
    # wlt_ref: (E, C)       bl_ref: (1, C)       o_ref : (1, Lout, C)
    txt = txt_ref[0].astype(jnp.float32)
    h = jnp.dot(wc_ref[...].astype(jnp.float32), txt,
                preferred_element_type=jnp.float32) + bc_ref[...].astype(jnp.float32)
    h = _gelu_tanh(h)
    out = jnp.dot(h, wlt_ref[...].astype(jnp.float32),
                  preferred_element_type=jnp.float32) + bl_ref[...].astype(jnp.float32)
    o_ref[0] = _leaky_relu(out).astype(o_ref.dtype)


def _ln_pe_kernel(x_ref, g_ref, b_ref, pe_ref, ln_ref, lnpe_ref):
    # x_ref: (1, tn, C)  g/b: (1, C)  pe: (tn, C)
    x = x_ref[0].astype(jnp.float32)
    mu = jnp.mean(x, axis=-1, keepdims=True)
    xc = x - mu
    var = jnp.mean(xc * xc, axis=-1, keepdims=True)
    ln = xc * jax.lax.rsqrt(var + _LN_EPS) * g_ref[...].astype(jnp.float32) \
        + b_ref[...].astype(jnp.float32)
    ln_ref[0] = ln.astype(ln_ref.dtype)
    lnpe_ref[0] = (ln + pe_ref[...].astype(jnp.float32)).astype(lnpe_ref.dtype)


def _ln_res_kernel(x_ref, g_ref, b_ref, res_ref, scale_ref, o_ref):
    # o = res + scale * LayerNorm(x);  scale is a (1,) f32 scalar in SMEM.
    x = x_ref[0].astype(jnp.float32)
    mu = jnp.mean(x, axis=-1, keepdims=True)
    xc = x - mu
    var = jnp.mean(xc * xc, axis=-1, keepdims=True)
    ln = xc * jax.lax.rsqrt(var + _LN_EPS) * g_ref[...].astype(jnp.float32) \
        + b_ref[...].astype(jnp.float32)
    o_ref[0] = (res_ref[0].astype(jnp.float32) + scale_ref[0] * ln).astype(o_ref.dtype)


def _linear_kernel(x_ref, wt_ref, b_ref, o_ref):
    # x: (tr, K)  wt: (K, Nout)  b: (1, Nout)  o: (tr, Nout)
    acc = jnp.dot(x_ref[...].astype(jnp.float32), wt_ref[...].astype(jnp.float32),
                  preferred_element_type=jnp.float32)
    o_ref[...] = (acc + b_ref[...].astype(jnp.float32)).astype(o_ref.dtype)


def _attn_core_kernel(q_ref, k_ref, v_ref, o_ref, *, sm_scale):
    # q: (1, tq, Dh)  k,v: (1, L, Dh)  o: (1, tq, Dh)
    q = q_ref[0].astype(jnp.float32)
    k = k_ref[0].astype(jnp.float32)
    v = v_ref[0].astype(jnp.float32)
    s = jax.lax.dot_general(q, k, (((1,), (1,)), ((), ())),
                            preferred_element_type=jnp.float32) * sm_scale   # (tq, L)
    m = jnp.max(s, axis=-1, keepdims=True)
    p = jnp.exp(s - m)
    denom = jnp.sum(p, axis=-1, keepdims=True)
    o = jnp.dot(p, v, preferred_element_type=jnp.float32) * pl.reciprocal(denom, approx=False)
    o_ref[0] = o.astype(o_ref.dtype)


# ----------------------------- wrappers ------------------------------------ #

def _text_project(txt, wc, bc, wl, bl):
    B, Lin, E = txt.shape
    Lout = wc.shape[0]
    C = wl.shape[0]
    return pl.pallas_call(
        _text_project_kernel,
        out_shape=jax.ShapeDtypeStruct((B, Lout, C), txt.dtype),
        grid=(B,),
        in_specs=[pl.BlockSpec((1, Lin, E), lambda b: (b, 0, 0)),
                  pl.BlockSpec((Lout, Lin), lambda b: (0, 0)),
                  pl.BlockSpec((Lout, 1), lambda b: (0, 0)),
                  pl.BlockSpec((E, C), lambda b: (0, 0)),
                  pl.BlockSpec((1, C), lambda b: (0, 0))],
        out_specs=pl.BlockSpec((1, Lout, C), lambda b: (b, 0, 0)),
        compiler_params=_cparams(("parallel",)),
    )(txt, wc, bc.reshape(Lout, 1), wl.T, bl.reshape(1, C))


def _layernorm_pe(x, gamma, beta, pe):
    B, N, C = x.shape
    tn = min(N, 256)
    return pl.pallas_call(
        _ln_pe_kernel,
        out_shape=(jax.ShapeDtypeStruct((B, N, C), x.dtype),
                   jax.ShapeDtypeStruct((B, N, C), x.dtype)),
        grid=(B, pl.cdiv(N, tn)),
        in_specs=[pl.BlockSpec((1, tn, C), lambda b, i: (b, i, 0)),
                  pl.BlockSpec((1, C), lambda b, i: (0, 0)),
                  pl.BlockSpec((1, C), lambda b, i: (0, 0)),
                  pl.BlockSpec((tn, C), lambda b, i: (i, 0))],
        out_specs=(pl.BlockSpec((1, tn, C), lambda b, i: (b, i, 0)),
                   pl.BlockSpec((1, tn, C), lambda b, i: (b, i, 0))),
        compiler_params=_cparams(("parallel", "parallel")),
    )(x, gamma.reshape(1, C), beta.reshape(1, C), pe)


def _layernorm_res(x, gamma, beta, res, scale):
    B, N, C = x.shape
    tn = min(N, 256)
    scale_arr = jnp.asarray(scale, jnp.float32).reshape(1)
    return pl.pallas_call(
        _ln_res_kernel,
        out_shape=jax.ShapeDtypeStruct((B, N, C), x.dtype),
        grid=(B, pl.cdiv(N, tn)),
        in_specs=[pl.BlockSpec((1, tn, C), lambda b, i: (b, i, 0)),
                  pl.BlockSpec((1, C), lambda b, i: (0, 0)),
                  pl.BlockSpec((1, C), lambda b, i: (0, 0)),
                  pl.BlockSpec((1, tn, C), lambda b, i: (b, i, 0)),
                  pl.BlockSpec(memory_space=pltpu.MemorySpace.SMEM)],
        out_specs=pl.BlockSpec((1, tn, C), lambda b, i: (b, i, 0)),
        compiler_params=_cparams(("parallel", "parallel")),
    )(x, gamma.reshape(1, C), beta.reshape(1, C), res, scale_arr)


def _linear(x2d, w, b):
    # x2d: (R, K); w: (Nout, K) in PyTorch Linear layout; b: (Nout,)
    R, K = x2d.shape
    Nout = w.shape[0]
    tr = min(R, 256)
    return pl.pallas_call(
        _linear_kernel,
        out_shape=jax.ShapeDtypeStruct((R, Nout), x2d.dtype),
        grid=(pl.cdiv(R, tr),),
        in_specs=[pl.BlockSpec((tr, K), lambda i: (i, 0)),
                  pl.BlockSpec((K, Nout), lambda i: (0, 0)),
                  pl.BlockSpec((1, Nout), lambda i: (0, 0))],
        out_specs=pl.BlockSpec((tr, Nout), lambda i: (i, 0)),
        compiler_params=_cparams(("parallel",)),
        cost_estimate=pl.CostEstimate(
            flops=2 * R * K * Nout, transcendentals=0,
            bytes_accessed=4 * (R * K + K * Nout + Nout + R * Nout)),
    )(x2d, w.T, b.reshape(1, Nout))


def _mha(q_in, k_in, v_in, ap, num_heads):
    """PyTorch nn.MultiheadAttention (batch_first) with separate q/k/v inputs."""
    B, Nq, C = q_in.shape
    Lk = k_in.shape[1]
    Dh = C // num_heads
    q = _linear(q_in.reshape(B * Nq, C), ap["wq"], ap["bq"]).reshape(B, Nq, C)
    k = _linear(k_in.reshape(B * Lk, C), ap["wk"], ap["bk"]).reshape(B, Lk, C)
    v = _linear(v_in.reshape(B * Lk, C), ap["wv"], ap["bv"]).reshape(B, Lk, C)

    def split_heads(t, L):
        return t.reshape(B, L, num_heads, Dh).transpose(0, 2, 1, 3).reshape(B * num_heads, L, Dh)

    qh, kh, vh = split_heads(q, Nq), split_heads(k, Lk), split_heads(v, Lk)
    tq = min(Nq, 256)
    BH = B * num_heads
    sm_scale = 1.0 / math.sqrt(Dh)
    oh = pl.pallas_call(
        functools.partial(_attn_core_kernel, sm_scale=sm_scale),
        out_shape=jax.ShapeDtypeStruct((BH, Nq, Dh), q_in.dtype),
        grid=(BH, pl.cdiv(Nq, tq)),
        in_specs=[pl.BlockSpec((1, tq, Dh), lambda bh, qi: (bh, qi, 0)),
                  pl.BlockSpec((1, Lk, Dh), lambda bh, qi: (bh, 0, 0)),
                  pl.BlockSpec((1, Lk, Dh), lambda bh, qi: (bh, 0, 0))],
        out_specs=pl.BlockSpec((1, tq, Dh), lambda bh, qi: (bh, qi, 0)),
        compiler_params=_cparams(("parallel", "parallel")),
        cost_estimate=pl.CostEstimate(
            flops=4 * BH * Nq * Lk * Dh, transcendentals=BH * Nq * Lk,
            bytes_accessed=4 * BH * (2 * Nq * Dh + 2 * Lk * Dh)),
    )(qh, kh, vh)
    o = oh.reshape(B, num_heads, Nq, Dh).transpose(0, 2, 1, 3).reshape(B, Nq, C)
    return _linear(o.reshape(B * Nq, C), ap["wo"], ap["bo"]).reshape(B, Nq, C)


# ------------------------- module-level forward ----------------------------- #

def guide_decoder_layer_forward(x, txt, params):
    """x: (B, N, C) visual tokens; txt: (B, L_in, E) text embeddings."""
    B, N, C = x.shape
    txt_p = _text_project(txt, params["tp_wconv"], params["tp_bconv"],
                          params["tp_wlin"], params["tp_blin"])          # (B, L_out, C)
    pe_vis = params["pe_vis"][:N]
    pe_txt = params["pe_txt"][: txt_p.shape[1]]

    # --- self-attention block ---
    ln1, ln1_pe = _layernorm_pe(x, params["norm1_g"], params["norm1_b"], pe_vis)
    sa = _mha(ln1_pe, ln1_pe, ln1, params["self_attn"], num_heads=1)
    vis = _layernorm_res(sa, params["sa_norm_g"], params["sa_norm_b"], x, 1.0)

    # --- cross-attention block ---
    _, ln2_pe = _layernorm_pe(vis, params["norm2_g"], params["norm2_b"], pe_vis)
    txt_pe = txt_p + pe_txt[None]          # tiny elementwise add, kept in XLA
    ca = _mha(ln2_pe, txt_pe, txt_p, params["cross_attn"], num_heads=4)
    return _layernorm_res(ca, params["ca_norm_g"], params["ca_norm_b"], vis, params["scale"])


def guide_decoder_forward(vis, skip_vis, txt, skip_encoder, spatial_size, params):
    if txt is not None:
        vis = guide_decoder_layer_forward(vis, txt, params)
    B, N, C = vis.shape
    H = W = spatial_size
    vis_nchw = jnp.transpose(vis.reshape(B, H, W, C), (0, 3, 1, 2))
    # TODO(synk): UnetrUpBlock / UnetrUpBlock_PMM / PossibilityMinMaxLayer (MONAI,
    # not defined in the spec) — transposed-conv upsample + skip fusion not implemented;
    # skip_vis / skip_encoder are unused and the guide-layer output is returned.
    return jnp.transpose(vis_nchw, (0, 2, 3, 1)).reshape(B, H * W, C)


# ------------------------------ reference ----------------------------------- #

def _reference(x, txt, params):
    def ln(v, g, b):
        mu = v.mean(-1, keepdims=True)
        var = ((v - mu) ** 2).mean(-1, keepdims=True)
        return (v - mu) * jax.lax.rsqrt(var + _LN_EPS) * g + b

    def mha(q_in, k_in, v_in, ap, H):
        B, Nq, C = q_in.shape
        Lk = k_in.shape[1]
        Dh = C // H
        q = q_in @ ap["wq"].T + ap["bq"]
        k = k_in @ ap["wk"].T + ap["bk"]
        v = v_in @ ap["wv"].T + ap["bv"]
        sp = lambda t, L: t.reshape(B, L, H, Dh).transpose(0, 2, 1, 3)
        qh, kh, vh = sp(q, Nq), sp(k, Lk), sp(v, Lk)
        s = jnp.einsum("bhqd,bhkd->bhqk", qh, kh) / math.sqrt(Dh)
        p = jax.nn.softmax(s, axis=-1)
        o = jnp.einsum("bhqk,bhkd->bhqd", p, vh).transpose(0, 2, 1, 3).reshape(B, Nq, C)
        return o @ ap["wo"].T + ap["bo"]

    h = jnp.einsum("oi,bie->boe", params["tp_wconv"], txt) + params["tp_bconv"][None, :, None]
    h = _gelu_tanh(h)
    txt_p = jnp.einsum("ble,ce->blc", h, params["tp_wlin"]) + params["tp_blin"]
    txt_p = _leaky_relu(txt_p)

    pe_vis = params["pe_vis"][: x.shape[1]]
    pe_txt = params["pe_txt"][: txt_p.shape[1]]

    vis2 = ln(x, params["norm1_g"], params["norm1_b"])
    qk = vis2 + pe_vis[None]
    sa = mha(qk, qk, vis2, params["self_attn"], 1)
    vis = x + ln(sa, params["sa_norm_g"], params["sa_norm_b"])
    vis2 = ln(vis, params["norm2_g"], params["norm2_b"])
    ca = mha(vis2 + pe_vis[None], txt_p + pe_txt[None], txt_p, params["cross_attn"], 4)
    return vis + params["scale"] * ln(ca, params["ca_norm_g"], params["ca_norm_b"])


def sinusoid_pe(length, d_model):
    pos = jnp.arange(length, dtype=jnp.float32)[:, None]
    div = jnp.exp(jnp.arange(0, d_model, 2, dtype=jnp.float32) * (-math.log(10000.0) / d_model))
    pe = jnp.zeros((length, d_model), jnp.float32)
    pe = pe.at[:, 0::2].set(jnp.sin(pos * div))
    pe = pe.at[:, 1::2].set(jnp.cos(pos * div))
    return pe


# --------------------------------- demo ------------------------------------- #

if __name__ == "__main__":
    key = jax.random.PRNGKey(0)
    B, C, S = 2, 32, 8                 # batch, in_channels, spatial_size
    N = S * S                          # 64 visual tokens
    Lin, Lout, E = 24, 8, 64           # input_text_len, text_len, embed_dim (small demo)

    ks = jax.random.split(key, 16)
    nrm = lambda k, shape, s=0.05: jax.random.normal(k, shape, jnp.float32) * s

    x = jax.random.normal(ks[0], (B, N, C), jnp.float32)
    txt = jax.random.normal(ks[1], (B, Lin, E), jnp.float32)
    skip_vis = jax.random.normal(ks[2], (B, (2 * S) * (2 * S), C), jnp.float32)  # unused (TODO)

    def attn_params(kk):
        k8 = jax.random.split(kk, 8)
        return dict(wq=nrm(k8[0], (C, C)), bq=nrm(k8[1], (C,), 0.02),
                    wk=nrm(k8[2], (C, C)), bk=nrm(k8[3], (C,), 0.02),
                    wv=nrm(k8[4], (C, C)), bv=nrm(k8[5], (C,), 0.02),
                    wo=nrm(k8[6], (C, C)), bo=nrm(k8[7], (C,), 0.02))

    def ln_params(kk):
        k2 = jax.random.split(kk, 2)
        return 1.0 + nrm(k2[0], (C,), 0.1), nrm(k2[1], (C,), 0.05)

    n1g, n1b = ln_params(ks[3])
    sag, sab = ln_params(ks[4])
    n2g, n2b = ln_params(ks[5])
    cag, cab = ln_params(ks[6])

    params = dict(
        tp_wconv=nrm(ks[7], (Lout, Lin)), tp_bconv=nrm(ks[8], (Lout,), 0.02),
        tp_wlin=nrm(ks[9], (C, E)), tp_blin=nrm(ks[10], (C,), 0.02),
        norm1_g=n1g, norm1_b=n1b, sa_norm_g=sag, sa_norm_b=sab,
        norm2_g=n2g, norm2_b=n2b, ca_norm_g=cag, ca_norm_b=cab,
        self_attn=attn_params(ks[11]), cross_attn=attn_params(ks[12]),
        scale=jnp.float32(0.01),
        pe_vis=sinusoid_pe(N, C), pe_txt=sinusoid_pe(Lout, C),
    )

    out = guide_decoder_forward(x, skip_vis, txt, None, S, params)
    out = jax.block_until_ready(out)

    ref = _reference(x, txt, params)
    assert out.shape == (B, N, C)
    max_err = float(jnp.max(jnp.abs(out - ref)))
    assert jnp.allclose(out, ref, atol=2e-3, rtol=2e-3), f"mismatch vs reference ({max_err})"

    print("KERNEL_OK")
</pallas_src>

<mosaic_0001>
module attributes {stable_mosaic.version = 11 : i64} {
  func.func @_text_project_kernel(%arg0: i32, %arg1: memref<1x24x64xf32, #tpu.memory_space<vmem>>, %arg2: memref<8x24xf32, #tpu.memory_space<vmem>>, %arg3: memref<8x1xf32, #tpu.memory_space<vmem>>, %arg4: memref<64x32xf32, #tpu.memory_space<vmem>>, %arg5: memref<1x32xf32, #tpu.memory_space<vmem>>, %arg6: memref<1x8x32xf32, #tpu.memory_space<vmem>>) attributes {dimension_semantics = [#tpu.dimension_semantics<parallel>], iteration_bounds = array<i64: 2>, scalar_prefetch = 0 : i64, scratch_operands = 0 : i64, tpu.core_type = #tpu.core_type<tc>, window_params = [{transform_indices = @transform_0, window_bounds = array<i64: 1, 24, 64>}, {pipeline_mode = #tpu.pipeline_mode<synchronous>, transform_indices = @transform_1, window_bounds = array<i64: 8, 24>}, {pipeline_mode = #tpu.pipeline_mode<synchronous>, transform_indices = @transform_2, window_bounds = array<i64: 8, 1>}, {pipeline_mode = #tpu.pipeline_mode<synchronous>, transform_indices = @transform_3, window_bounds = array<i64: 64, 32>}, {pipeline_mode = #tpu.pipeline_mode<synchronous>, transform_indices = @transform_4, window_bounds = array<i64: 1, 32>}, {transform_indices = @transform_5, window_bounds = array<i64: 1, 8, 32>}]} {
    %c0 = arith.constant 0 : index
    %c0_0 = arith.constant 0 : index
    %c0_1 = arith.constant 0 : index
    %0 = vector.load %arg1[%c0, %c0_0, %c0_1] : memref<1x24x64xf32, #tpu.memory_space<vmem>>, vector<1x24x64xf32>
    %1 = vector.shape_cast %0 : vector<1x24x64xf32> to vector<24x64xf32>
    %c0_2 = arith.constant 0 : index
    %c0_3 = arith.constant 0 : index
    %2 = vector.load %arg2[%c0_2, %c0_3] : memref<8x24xf32, #tpu.memory_space<vmem>>, vector<8x24xf32>
    %cst = arith.constant dense<0.000000e+00> : vector<8x64xf32>
    %3 = tpu.matmul %2, %1, %cst {dimension_numbers = #tpu.dot_dimension_numbers<[1], [0], [0], [1], [0, 0, 1, 1], [], []>} : vector<8x24xf32>, vector<24x64xf32>, vector<8x64xf32> -> vector<8x64xf32>
    %c0_4 = arith.constant 0 : index
    %c0_5 = arith.constant 0 : index
    %4 = vector.load %arg3[%c0_4, %c0_5] : memref<8x1xf32, #tpu.memory_space<vmem>>, vector<8x1xf32>
    %5 = vector.broadcast %4 : vector<8x1xf32> to vector<8x64xf32>
    %6 = arith.addf %3, %5 : vector<8x64xf32>
    %cst_6 = arith.constant 5.000000e-01 : f32
    %7 = vector.broadcast %cst_6 : f32 to vector<8x64xf32>
    %8 = arith.mulf %7, %6 : vector<8x64xf32>
    %cst_7 = arith.constant 4.471500e-02 : f32
    %9 = vector.broadcast %cst_7 : f32 to vector<8x64xf32>
    %10 = arith.mulf %9, %6 : vector<8x64xf32>
    %11 = arith.mulf %10, %6 : vector<8x64xf32>
    %12 = arith.mulf %11, %6 : vector<8x64xf32>
    %13 = arith.addf %6, %12 : vector<8x64xf32>
    %cst_8 = arith.constant 0.797884583 : f32
    %14 = vector.broadcast %cst_8 : f32 to vector<8x64xf32>
    %15 = arith.mulf %14, %13 : vector<8x64xf32>
    %16 = math.tanh %15 : vector<8x64xf32>
    %cst_9 = arith.constant 1.000000e+00 : f32
    %17 = vector.broadcast %cst_9 : f32 to vector<8x64xf32>
    %18 = arith.addf %17, %16 : vector<8x64xf32>
    %19 = arith.mulf %8, %18 : vector<8x64xf32>
    %c0_10 = arith.constant 0 : index
    %c0_11 = arith.constant 0 : index
    %20 = vector.load %arg4[%c0_10, %c0_11] : memref<64x32xf32, #tpu.memory_space<vmem>>, vector<64x32xf32>
    %cst_12 = arith.constant dense<0.000000e+00> : vector<8x32xf32>
    %21 = tpu.matmul %19, %20, %cst_12 {dimension_numbers = #tpu.dot_dimension_numbers<[1], [0], [0], [1], [0, 0, 1, 1], [], []>} : vector<8x64xf32>, vector<64x32xf32>, vector<8x32xf32> -> vector<8x32xf32>
    %c0_13 = arith.constant 0 : index
    %c0_14 = arith.constant 0 : index
    %22 = vector.load %arg5[%c0_13, %c0_14] : memref<1x32xf32, #tpu.memory_space<vmem>>, vector<1x32xf32>
    %23 = vector.broadcast %22 : vector<1x32xf32> to vector<8x32xf32>
    %24 = arith.addf %21, %23 : vector<8x32xf32>
    %cst_15 = arith.constant 0.000000e+00 : f32
    %25 = vector.broadcast %cst_15 : f32 to vector<8x32xf32>
    %26 = arith.cmpf oge, %24, %25 : vector<8x32xf32>
    %cst_16 = arith.constant 0.00999999977 : f32
    %27 = vector.broadcast %cst_16 : f32 to vector<8x32xf32>
    %28 = arith.mulf %27, %24 : vector<8x32xf32>
    %29 = arith.select %26, %24, %28 : vector<8x32xi1>, vector<8x32xf32>
    %c0_17 = arith.constant 0 : index
    %c0_18 = arith.constant 0 : index
    %c0_19 = arith.constant 0 : index
    %30 = vector.load %arg6[%c0_17, %c0_18, %c0_19] : memref<1x8x32xf32, #tpu.memory_space<vmem>>, vector<1x8x32xf32>
    %31 = vector.shape_cast %30 : vector<1x8x32xf32> to vector<8x32xf32>
    %32 = vector.shape_cast %29 : vector<8x32xf32> to vector<1x8x32xf32>
    tpu.vector_store %arg6[%c0_17, %c0_18, %c0_19], %32 {strides = array<i32>} : memref<1x8x32xf32, #tpu.memory_space<vmem>>, vector<1x8x32xf32>,
    return
  }
  func.func @transform_0(%arg0: i32) -> (i32, i32, i32) {
    %c0_i32 = arith.constant 0 : i32
    %c0_i32_0 = arith.constant 0 : i32
    %c0_i32_1 = arith.constant 0 : i32
    return %arg0, %c0_i32, %c0_i32_0 : i32, i32, i32
  }
  func.func @transform_1(%arg0: i32) -> (i32, i32) {
    %c0_i32 = arith.constant 0 : i32
    %c0_i32_0 = arith.constant 0 : i32
    %c0_i32_1 = arith.constant 0 : i32
    return %c0_i32, %c0_i32_0 : i32, i32
  }
  func.func @transform_2(%arg0: i32) -> (i32, i32) {
    %c0_i32 = arith.constant 0 : i32
    %c0_i32_0 = arith.constant 0 : i32
    %c0_i32_1 = arith.constant 0 : i32
    return %c0_i32, %c0_i32_0 : i32, i32
  }
  func.func @transform_3(%arg0: i32) -> (i32, i32) {
    %c0_i32 = arith.constant 0 : i32
    %c0_i32_0 = arith.constant 0 : i32
    %c0_i32_1 = arith.constant 0 : i32
    return %c0_i32, %c0_i32_0 : i32, i32
  }
  func.func @transform_4(%arg0: i32) -> (i32, i32) {
    %c0_i32 = arith.constant 0 : i32
    %c0_i32_0 = arith.constant 0 : i32
    %c0_i32_1 = arith.constant 0 : i32
    return %c0_i32, %c0_i32_0 : i32, i32
  }
  func.func @transform_5(%arg0: i32) -> (i32, i32, i32) {
    %c0_i32 = arith.constant 0 : i32
    %c0_i32_0 = arith.constant 0 : i32
    %c0_i32_1 = arith.constant 0 : i32
    return %arg0, %c0_i32, %c0_i32_0 : i32, i32, i32
  }
}

</mosaic_0001>

<bundles_post_ra>
// kernel: tpu_custom_call.1
= control target key start
LH: loop header
LB: loop body
LE: loop exit
PB: predicated region body
PF: predicated region fallthrough
CT: control target
= control target key end

     0   :  { %10 = vsyncpa [#allocation3], 0  ;;  %s805_s0 = inlined_call_operand.vmem [shape: f32[2,24,64], index: 0, kind: input, shape index: {}]   ;;  %s806_s1 = inlined_call_operand.vmem [shape: f32[8,24], index: 1, kind: input, shape index: {}]   ;;  %s807_s2 = inlined_call_operand.vmem [shape: f32[8,1], index: 2, kind: input, shape index: {}]   ;;  %s808_s3 = inlined_call_operand.vmem [shape: f32[64,32], index: 3, kind: input, shape index: {}]   ;;  %s809_s4 = inlined_call_operand.vmem [shape: f32[1,32], index: 4, kind: input, shape index: {}]   ;;  %s810_s5 = inlined_call_operand.hbm [shape: f32[2,8,32], index: 5, kind: output, shape index: {}]  }
   0x1   :  { %12 = vsyncpa [#allocation3 + $0x1], 0  ;;  %s679_s18 = smov 0   ;;  %s681_s19 = smov 0  }
   0x2   :  { %s683_s20 = smov 0   ;;  %s685_s21 = smov 0  }
   0x3 LB: > { %s700_s22 = sadd.s32 4294967295, %s643_s21   ;;  %s483_s23 = sadd.s32 4294967294, %s643_s21   ;;  %s643_s21 = sphi %s685_s21, %s816_s21   ;;  %s639_s20 = sphi %s683_s20, %s815_s20   ;;  %s635_s19 = sphi %s681_s19, %s814_s19   ;;  %s631_s18 = sphi %s679_s18, %s813_s18  }
   0x4   : > { %s704_s24 = sadd.s32 1, %s643_s21   ;;  %s135_s25 = sadd.s32 1, %s639_s20 }
   0x5   : > { %s132_s26 = ssub.s32 %s643_s21, %s704_s24  ;;  %p145_p0 = scmp.ne.s32.totalorder %s639_s20, %s635_s19 }
   0x6   : > { %p133_p1 = scmp.eq.s32.totalorder %s132_s26, 0  ;;  %p146_p2 = scmp.eq.s32.totalorder %s700_s22, 1 }
   0x7   : > { %p151_p3 = scmp.ne.s32.totalorder %s635_s19, %s631_s18  ;;  %p152_p4 = scmp.eq.s32.totalorder %s483_s23, 1 }
   0x8   : > { %s715_s27 = scalar_select %p133_p1, %s639_s20, %s135_s25  }
   0x9   : > { %p717_p5 = por %p146_p2, %p145_p0  ;;  %p721_p6 = por %p152_p4, %p151_p3 }
   0xa   : > { %p486_p7 = scmp.ge.s32.totalorder %s643_s21, 1  ;;  %p190_p8 = scmp.lt.s32.totalorder %s643_s21, 3 }
   0xc   : > { %p191_p9 = pnand %p486_p7, %p190_p8 }
   0xd   : > { %p218_p10 = scmp.lt.s32.totalorder (!%p191_p9), %s700_s22, 1  ;;  %s215_s14 = sand.u32 (!%p191_p9), 1, %s635_s19  }
   0xe   : > { %194 = sbr.rel (%p191_p9) target bundleno = 464 (0x1d0), region = 40  ;;  %s487_s15 = sshll.u32 (!%p191_p9), %s215_s14, 3 }
   0xf   : > { %s493_s23 = sshll.u32 (!%p191_p9), %s700_s22, 7  ;;  %s217_s25 = scalar_lea.vmem (!%p191_p9), [#allocation2], %s487_s15 }
  0x10   : > { %s424_s26 = sshll.u32 (!%p191_p9), %s217_s25, 4  ;;  %s425_s26 = int_to_ptr.vmem [resolvable:$true] %s424_s26 }
  0x11   : > { %s583_s9 = scalar_lea.vmem (!%p191_p9), %s425_s26, 128 }
  0x12   : > { %p584_p11 = scmp.ne.s32.totalorder (!%p191_p9), %s425_s26, %s583_s9 }
  0x13   : > { %v645_v0 = vmov 0.0   ;;  %vm646_vm0 = vmmov 0   ;;  %v227_v1 = vld [vmem:[%s807_s2] sm:$0xff]  ;;  %s219_s7 = scalar_select %p218_p10, %s700_s22, 1  ;;  %v647_v2 = vmov 0   ;;  %vm233_vm1 = vcmask 195584  }
  0x14   : > { %509 = vmatprep.subr.mxu0 %v645_v0  ;;  %515 = vmatprep.mubr.msk.f32.mxu0 %vm646_vm0, %v645_v0  ;;  %v226_v6 = vld [vmem:[%s806_s1] sm:$0xff]  ;;  %v323_v7 = vld [vmem:[%s808_s3 + $0x38] sm:$0xff]  ;;  %v322_v8 = vld [vmem:[%s808_s3 + $0x30] sm:$0xff]  ;;  %vm331_vm2 = vcmask 523264   ;;  %vm408_vm4 = vcmask 261120   ;;  %p585_p12 = pnand %p584_p11, %p717_p5  ;;  %s648_s22 = smov [#allocation2]  }
  0x15   : > { %580 = vset.pattern.permute.xlu0 %v647_v2  ;;  %518 = vmatprep.subr.mxu1 %v645_v0  ;;  %s537_s8 = smul.u32 24, %s219_s7  ;;  %v321_v9 = vld [vmem:[%s808_s3 + $0x28] sm:$0xff]  ;;  %v320_v10 = vld [vmem:[%s808_s3 + $0x20] sm:$0xff]  ;;  %v319_v11 = vld [vmem:[%s808_s3 + $0x18] sm:$0xff]  ;;  %s770_s7 = scalar_lea.hbm %s810_s5, %s493_s23 }
  0x16   : > { %230 = vperm.xlu0 %580, %v227_v1   ;;  %534 = vmatprep.mubr.msk.f32.mxu1 %vm646_vm0, %v645_v0  ;;  %v318_v12 = vld [vmem:[%s808_s3 + $0x10] sm:$0xff]  ;;  %v317_v13 = vld [vmem:[%s808_s3 + $0x8] sm:$0xff]  ;;  %v316_v14 = vld [vmem:[%s808_s3] sm:$0xff]  ;;  %p586_p13 = pneg %p585_p12  ;;  %s587_s10 = sshll.u32 %s648_s22, 4  ;;  %s588_s10 = int_to_ptr.vmem [resolvable:$false] %s587_s10 }
  0x17   : > { %s222_s11 = scalar_lea.vmem %s805_s0, %s537_s8  ;;  %519 = vmatpush3.msra.mxu1 %v323_v7  ;;  %v490_v28 = vld [vmem:[%s809_s4] ss:$0 sm:$0xff]  ;;  %s411_s8 = scalar_lea.sflag [#allocation3], %s215_s14 }
  0x18   : > { %v225_v3 = vld [vmem:[%s222_s11 + $0x10] sm:$0xff]  ;;  %v224_v4 = vld [vmem:[%s222_s11 + $0x8] sm:$0xff]  ;;  %v223_v5 = vld [vmem:[%s222_s11] sm:$0xff]  ;;  %520 = vmatprep.subr.mxu1 %v645_v0  ;;  %s589_s11 = scalar_lea.vmem %s588_s10, 256  ;;  %p590_p0 = scmp.lt.s32.totalorder %s425_s26, %s588_s10 }
  0x19   : > { %510 = vmatpush3.msra.mxu0 %v225_v3  ;;  %521 = vmatpush3.msra.mxu1 %v322_v8  ;;  %p591_p1 = scmp.lt.s32.totalorder %s589_s11, %s583_s9 }
  0x1a   : > { %511 = vmatprep.subr.mxu0 %v645_v0  ;;  %522 = vmatprep.subr.mxu1 %v645_v0 }
  0x1b   : > { %512 = vmatpush3.msra.mxu0 %v224_v4  ;;  %523 = vmatpush3.msra.mxu1 %v321_v9  ;;  %p592_p2 = por %p591_p1, %p590_p0 }
  0x1c   : > { %513 = vmatprep.subr.mxu0 %v645_v0  ;;  %524 = vmatprep.subr.mxu1 %v645_v0 }
  0x1d   : > { %514 = vmatpush3.msra.mxu0 %v223_v5  ;;  %525 = vmatpush3.msra.mxu1 %v320_v10  ;;  %p593_p3 = pnand %p592_p2, %p586_p13 }
  0x1e   : > { %516 = vmatmul.mubr.msk.f32.vlgmr.msra.gmra.mxu0 %vm233_vm1, %v226_v6  ;;  %526 = vmatprep.subr.mxu1 %v645_v0 }
  0x1f   : > { %527 = vmatpush3.msra.mxu1 %v319_v11 }
  0x20   : > { %528 = vmatprep.subr.mxu1 %v645_v0 }
  0x21   : > { %529 = vmatpush3.msra.mxu1 %v318_v12 }
  0x22   : > { %530 = vmatprep.subr.mxu1 %v645_v0 }
  0x23   : > { %531 = vmatpush3.msra.mxu1 %v317_v13 }
  0x24   : > { %532 = vmatprep.subr.mxu1 %v645_v0 }
  0x25   : > { %533 = vmatpush3.msra.mxu1 %v316_v14 }
  0x91   : > { %v231_v15 = vpop.permute.xlu0 %230 }
  0xde   : > { %v303_v16 = vpop.f32.mrf.mxu0 }
  0xdf   : > { %v304_v17 = vadd.f32 %v303_v16, %v231_v15 }
  0xe0   : > { %v517_v18 = vpop.f32.mrf.mxu0 }
  0xe1   : > { %v308_v19 = vmul.f32 0.044715, %v304_v17  ;;  %v307_v25 = vmul.f32 0.5, %v304_v17 }
  0xe3   : > { %v309_v20 = vmul.f32 %v308_v19, %v304_v17 }
  0xe5   : > { %v310_v21 = vmul.f32 %v309_v20, %v304_v17 }
  0xe7   : > { %v311_v22 = vadd.f32 %v310_v21, %v304_v17 }
  0xe9   : > { %v312_v23 = vmul.f32 0.7978846, %v311_v22 }
  0xeb   : > { %581 = vtanh.f32 %v312_v23 }
  0xf8   : > { %v582_v24 = vpop.eup %581 }
  0xf9   : > { %v314_v26 = vadd.f32 1.0, %v582_v24 }
  0xfb   : > { %v315_v27 = vmul.f32 %v314_v26, %v307_v25 }
  0xfd   : > { %535 = vmatmul.mubr.msk.f32.vlgmr.msra.gmra.mxu1 %vm331_vm2, %v315_v27 }
 0x1bd   : > { %v401_v29 = vpop.f32.mrf.mxu1 }
 0x1be   : > { %v402_v30 = vadd.f32 %v490_v28, %v401_v29 }
 0x1bf   : > { %v536_v31 = vpop.f32.mrf.mxu1 }
 0x1c0   : > { %vm405_vm3 = vcmp.ge.f32.partialorder %v402_v30, 0.0  ;;  %v406_v32 = vmul.f32 0.01, %v402_v30 }
 0x1c2   : > { %v407_v33 = vsel %vm405_vm3, %v402_v30, %v406_v32 }
 0x1c3   : > { %409 = vst.msk [vmem:[%s217_s25] sm:$0xff] %vm408_vm4, %v407_v33 }
 0x1c4   : > { %596 = shalt.err (!%p593_p3)
}
 0x1c5   : > { %s597_s12 = scalar_lea.hbm %s770_s7, 128  ;;  %s601_s15 = scalar_lea.hbm %s810_s5, 256 }
 0x1c6   : > { %p598_p4 = scmp.ne.s32.totalorder %s770_s7, %s597_s12  ;;  %p602_p9 = scmp.lt.s32.totalorder %s770_s7, %s810_s5 }
 0x1c7   : > { %p603_p10 = scmp.lt.s32.totalorder %s601_s15, %s597_s12 }
 0x1c8   : > { %p599_p7 = pnand %p598_p4, %p717_p5 }
 0x1c9   : > { %p604_p11 = por %p603_p10, %p602_p9 }
 0x1ca   : > { %p600_p8 = pneg %p599_p7 }
 0x1cc   : > { %p605_p12 = pnand %p604_p11, %p600_p8 }
 0x1ce   : > { %608 = shalt.err (!%p605_p12)
}
 0x1cf   : > { %538 = dma.vmem_to_hbm [thread:$0]  (%p717_p5), %s425_s26, 128, %s770_s7, %s411_s8  }
 0x1d0 PF: > { %p544_p13 = scmp.ge.s32.totalorder %s643_s21, 2  ;;  %s436_s23 = sand.u32 1, %s631_s18  }
 0x1d1   : > { %s437_s25 = scalar_lea.sflag [#allocation3], %s436_s23 }
 0x1d2   : > { %p541_p0 = pnand %p544_p13, %p721_p6 }
 0x1d4   : > { %p542_p1 = pneg %p541_p0 }
 0x1d6   : > { %626 = dma.done.wait (%p542_p1), %s437_s25, 128  }
 0x1d7   : > { %628 = vsyncadd (%p542_p1), %s437_s25, 4294967168  ;;  %p15_p2 = scmp.ge.s32.totalorder %s704_s24, 4   ;;  %s813_s18 = smov %s635_s19 }
 0x1d8   : > { %s814_s19 = smov %s639_s20  ;;  %s815_s20 = smov %s715_s27 }
 0x1d9   : > { %s816_s21 = smov %s704_s24  ;;  %17 = sbr.rel (!%p15_p2) target bundleno = 3 (0x3), region = 75 }
 0x1de   :  { %442 = vsyncpa [#allocation3], 1 }
 0x1df   :  { %444 = vsyncpa [#allocation3 + $0x1], 1 }

</bundles_post_ra>
